<compile_context>
chip_gen: v6e
topology: v6e:2x2x1
jax: 0.10.0
libtpu: 0.0.40
codegen_flags: <defaults>
</compile_context>

<pallas_src>
import functools
import jax
import jax.numpy as jnp
from jax.experimental import pallas as pl
from jax.experimental.pallas import tpu as pltpu


def _round_up(x, m):
    return ((x + m - 1) // m) * m


# ----------------------------------------------------------------------------
# Kernel 1: fused multi-graph, multi-layer propagation
#   for each graph g:  E_0 = X0 ;  E_{l+1} = (1-alpha) * A_g @ E_l + alpha * X0
# ----------------------------------------------------------------------------
def _fused_prop_kernel(a_ref, x0_ref, o_ref, e_ref, acc_ref, *, alpha, tm, tk):
    l = pl.program_id(1)
    i = pl.program_id(2)
    k = pl.program_id(3)
    nk = pl.num_programs(3)

    # Start of a new layer (first row/contraction tile): refresh the resident E.
    @pl.when(jnp.logical_and(i == 0, k == 0))
    def _():
        @pl.when(l == 0)
        def _():
            e_ref[...] = x0_ref[...]

        @pl.when(l > 0)
        def _():
            e_ref[...] = o_ref[...]  # previous layer's result, still in VMEM

    @pl.when(k == 0)
    def _():
        acc_ref[...] = jnp.zeros_like(acc_ref)

    k_off = pl.multiple_of(k * tk, tk)
    e_blk = e_ref[pl.ds(k_off, tk), :].astype(a_ref.dtype)  # bf16 for the MXU
    acc_ref[...] += jnp.dot(a_ref[...], e_blk, preferred_element_type=jnp.float32)

    @pl.when(k == nk - 1)
    def _():
        i_off = pl.multiple_of(i * tm, tm)
        o_ref[pl.ds(i_off, tm), :] = (
            (1.0 - alpha) * acc_ref[...] + alpha * x0_ref[pl.ds(i_off, tm), :]
        )


def fused_propagate(a_stack, x0, n_layers, alpha, *, a_dtype=jnp.bfloat16,
                    max_tile=512):
    """a_stack: (G, N, N) f32 normalized adjacencies; x0: (N, D) f32 shared input."""
    g, n, n2 = a_stack.shape
    assert n == n2 and x0.shape[0] == n
    d = x0.shape[1]

    tile = min(max_tile, _round_up(n, 128))  # (8,128)-aligned; capped for v7x VMEM
    tm = tk = tile
    n_pad = _round_up(n, tile)
    d_pad = _round_up(d, 128)                # lane-dense MXU output / stores

    a_p = jnp.pad(a_stack.astype(jnp.float32),
                  ((0, 0), (0, n_pad - n), (0, n_pad - n))).astype(a_dtype)
    x0_p = jnp.pad(x0.astype(jnp.float32), ((0, n_pad - n), (0, d_pad - d)))

    grid = (g, n_layers, n_pad // tm, n_pad // tk)
    flops = 2.0 * g * n_layers * n_pad * n_pad * d_pad
    bytes_accessed = (a_p.size * a_p.dtype.itemsize * n_layers
                      + x0_p.size * 4 + g * n_pad * d_pad * 4)

    out = pl.pallas_call(
        functools.partial(_fused_prop_kernel, alpha=float(alpha), tm=tm, tk=tk),
        out_shape=jax.ShapeDtypeStruct((g, n_pad, d_pad), jnp.float32),
        grid=grid,
        in_specs=[
            # A tiles: streamed / auto-pipelined, re-streamed per layer.
            pl.BlockSpec((None, tm, tk), lambda gg, l, i, k: (gg, i, k)),
            # X0: small (N*D), kept fully resident (constant index -> one DMA).
            pl.BlockSpec((n_pad, d_pad), lambda gg, l, i, k: (0, 0)),
        ],
        # Per-graph output block stays resident across layers; also acts as E_next.
        out_specs=pl.BlockSpec((None, n_pad, d_pad), lambda gg, l, i, k: (gg, 0, 0)),
        scratch_shapes=[
            pltpu.VMEM((n_pad, d_pad), jnp.float32),  # resident E (current layer)
            pltpu.VMEM((tm, d_pad), jnp.float32),     # f32 accumulator tile
        ],
        compiler_params=pltpu.CompilerParams(
            dimension_semantics=("parallel", "arbitrary", "arbitrary", "arbitrary"),
            vmem_limit_bytes=48 * 1024 * 1024,        # fits v7x's 64 MiB VMEM
        ),
        cost_estimate=pl.CostEstimate(
            flops=int(flops), transcendentals=0, bytes_accessed=int(bytes_accessed)),
    )(a_p, x0_p)
    return out[:, :n, :d]


# ----------------------------------------------------------------------------
# Kernel 2: rating  gamma = sum(u * i, dim=1), lane-dense output layout.
# Wrapper presents (D, B) slabs (B padded to a multiple of 128) so the kernel
# reduces over sublanes and stores an unmasked (1, B) lane-dense row.
# ----------------------------------------------------------------------------
def _rating_kernel(u_ref, i_ref, o_ref):
    o_ref[...] = jnp.sum(u_ref[...] * i_ref[...], axis=0, keepdims=True)


def rating(users_emb, items_emb, *, max_lane_tile=512):
    b, d = users_emb.shape
    d_pad = _round_up(d, 8)
    bt = min(max_lane_tile, _round_up(b, 128))
    b_pad = _round_up(b, bt)
    u_t = jnp.pad(users_emb.astype(jnp.float32).T, ((0, d_pad - d), (0, b_pad - b)))
    i_t = jnp.pad(items_emb.astype(jnp.float32).T, ((0, d_pad - d), (0, b_pad - b)))
    out = pl.pallas_call(
        _rating_kernel,
        out_shape=jax.ShapeDtypeStruct((1, b_pad), jnp.float32),
        grid=(b_pad // bt,),
        in_specs=[pl.BlockSpec((d_pad, bt), lambda j: (0, j)),
                  pl.BlockSpec((d_pad, bt), lambda j: (0, j))],
        out_specs=pl.BlockSpec((1, bt), lambda j: (0, j)),
        compiler_params=pltpu.CompilerParams(dimension_semantics=("parallel",)),
    )(u_t, i_t)
    return out[0, :b]


# ----------------------------------------------------------------------------
# TODO(synk): GRecConv's definition is not included in the reference snippet
# (it is a DGL sparse conv); implemented here as an alpha-residual LightGCN
# propagation over a dense symmetric-normalized adjacency. Edge dropout is a
# training-time op and is skipped (inference forward).
# ----------------------------------------------------------------------------
def make_norm_adj(n_users, n_items, edges_ui):
    """Dense symmetric-normalized bipartite adjacency, node order = [users; items]."""
    n = n_users + n_items
    a = jnp.zeros((n, n), dtype=jnp.float32)
    u_idx = edges_ui[:, 0]
    i_idx = edges_ui[:, 1] + n_users
    a = a.at[u_idx, i_idx].set(1.0)
    a = a.at[i_idx, u_idx].set(1.0)
    deg = jnp.sum(a, axis=1)
    d_inv_sqrt = jnp.where(deg > 0, 1.0 / jnp.sqrt(jnp.maximum(deg, 1e-12)), 0.0)
    return a * d_inv_sqrt[:, None] * d_inv_sqrt[None, :]


class EDDAJax:
    def __init__(self, key, tasks, hidden_dim=32, n_layers=2, alpha=0.1):
        self.tasks = tasks
        self.n_layers = n_layers
        self.alpha = alpha
        d = hidden_dim // 2

        # small synthetic domain sizes
        self.user_dict = {"A": 12, "B": 10}
        self.item_dict = {"A": 20, "B": 14}
        self.n_total_users = sum(self.user_dict[t] for t in tasks)
        self.n_total_items = sum(self.item_dict[t] for t in tasks)

        # global id ranges per domain (users / items laid out contiguously)
        self.user_domain = {}
        self.item_domain = {}
        uo, io = 0, 0
        for t in tasks:
            self.user_domain[t] = jnp.arange(uo, uo + self.user_dict[t])
            self.item_domain[t] = jnp.arange(io, io + self.item_dict[t])
            uo += self.user_dict[t]
            io += self.item_dict[t]

        # deterministic parameter init (normal, std=0.1) — mirrors nn.init.normal_
        keys = jax.random.split(key, 2 + 2 * len(tasks) + 2 * len(tasks) + 1)
        ki = iter(range(len(keys)))
        self.aggr_user = 0.1 * jax.random.normal(keys[next(ki)], (self.n_total_users, d))
        self.aggr_item = 0.1 * jax.random.normal(keys[next(ki)], (self.n_total_items, d))
        self.embedding_user = {
            t: 0.1 * jax.random.normal(keys[next(ki)], (self.user_dict[t], d)) for t in tasks
        }
        self.embedding_item = {
            t: 0.1 * jax.random.normal(keys[next(ki)], (self.item_dict[t], d)) for t in tasks
        }

        # synthetic interaction graphs (deterministic)
        self.graph_dict = {}
        aggr_edges = []
        for t in tasks:
            ku, kv = jax.random.split(keys[next(ki)])
            n_e = 3 * self.user_dict[t]
            eu = jax.random.randint(ku, (n_e,), 0, self.user_dict[t])
            ei = jax.random.randint(kv, (n_e,), 0, self.item_dict[t])
            edges_local = jnp.stack([eu, ei], axis=1)
            self.graph_dict[t] = make_norm_adj(self.user_dict[t], self.item_dict[t], edges_local)
            eg = jnp.stack([self.user_domain[t][eu], self.item_domain[t][ei]], axis=1)
            aggr_edges.append(eg)
        all_edges = jnp.concatenate(aggr_edges, axis=0)
        self.graph_dict["aggr"] = make_norm_adj(self.n_total_users, self.n_total_items, all_edges)
        # 'sep'+task : edges into that domain's items only (in_subgraph, bidirected)
        for t, eg in zip(tasks, aggr_edges):
            self.graph_dict["sep" + t] = make_norm_adj(
                self.n_total_users, self.n_total_items, eg
            )

    # ------------------------------------------------------------------
    def _computer_dis_intra(self, domain):
        users_emb = self.embedding_user[domain]
        items_emb = self.embedding_item[domain]
        x0 = jnp.concatenate([users_emb, items_emb], axis=0)
        a = self.graph_dict[domain][None]  # (1, N, N)
        light_out = fused_propagate(a, x0, self.n_layers, self.alpha)[0]
        nu = users_emb.shape[0]
        return light_out[:nu], light_out[nu:]

    def _computer_dis_inter(self, domain):
        x0 = jnp.concatenate([self.aggr_user, self.aggr_item], axis=0)
        nu = self.n_total_users
        # all 'sep' graphs share X0 -> one fused kernel call, G axis "parallel"
        a_stack = jnp.stack([self.graph_dict["sep" + dom] for dom in self.tasks], axis=0)
        t_embs = fused_propagate(a_stack, x0, self.n_layers, self.alpha)  # (G, N, d)
        embs = []
        for gi, _dom in enumerate(self.tasks):
            t = t_embs[gi]
            uss = t[:nu][self.user_domain[domain]]
            its = t[nu:][self.item_domain[domain]]
            embs.append(jnp.concatenate([uss, its], axis=0))
        light_out = jnp.mean(jnp.stack(embs, axis=1), axis=1)
        ndu = self.user_dict[domain]
        return light_out[:ndu], light_out[ndu:]

    def computer(self, domain):
        user_intra, item_intra = self._computer_dis_intra(domain)
        user_inter, item_inter = self._computer_dis_inter(domain)
        users_emb = jnp.concatenate([user_inter, user_intra], axis=1)
        items_emb = jnp.concatenate([item_inter, item_intra], axis=1)
        return users_emb, items_emb

    def forward(self, users, items, domain):
        all_users, all_items = self.computer(domain)
        users_emb = all_users[users]          # gather (glue)
        items_emb = all_items[items]
        gamma = rating(users_emb, items_emb)  # Pallas: mul + sublane reduce, lane-dense store
        return gamma

    # pure-JAX reference; quantize=True mirrors the kernel's bf16 MXU inputs
    def forward_ref(self, users, items, domain, quantize=False):
        def prop_ref(a, x):
            a_mm = a.astype(jnp.bfloat16) if quantize else a
            e = x
            for _ in range(self.n_layers):
                e_mm = e.astype(jnp.bfloat16) if quantize else e
                ax = jnp.dot(a_mm, e_mm, preferred_element_type=jnp.float32)
                e = (1.0 - self.alpha) * ax + self.alpha * x
            return e

        # intra
        li = jnp.concatenate([self.embedding_user[domain], self.embedding_item[domain]], axis=0)
        li = prop_ref(self.graph_dict[domain], li)
        nu_d = self.user_dict[domain]
        u_intra, i_intra = li[:nu_d], li[nu_d:]
        # inter
        la = jnp.concatenate([self.aggr_user, self.aggr_item], axis=0)
        nu = self.n_total_users
        embs = []
        for dom in self.tasks:
            t = prop_ref(self.graph_dict["sep" + dom], la)
            embs.append(
                jnp.concatenate(
                    [t[:nu][self.user_domain[domain]], t[nu:][self.item_domain[domain]]], axis=0
                )
            )
        lo = jnp.mean(jnp.stack(embs, axis=1), axis=1)
        u_inter, i_inter = lo[:nu_d], lo[nu_d:]
        au = jnp.concatenate([u_inter, u_intra], axis=1)
        ai = jnp.concatenate([i_inter, i_intra], axis=1)
        return jnp.sum(au[users] * ai[items], axis=1)


# ----------------------------------------------------------------------------
if __name__ == "__main__":
    key = jax.random.PRNGKey(0)
    k_model, k_u, k_i = jax.random.split(key, 3)

    tasks = ["A", "B"]
    model = EDDAJax(k_model, tasks, hidden_dim=32, n_layers=2, alpha=0.1)

    domain = "A"
    batch = 8
    users = jax.random.randint(k_u, (batch,), 0, model.user_dict[domain])
    items = jax.random.randint(k_i, (batch,), 0, model.item_dict[domain])

    gamma = jax.block_until_ready(model.forward(users, items, domain))
    assert gamma.shape == (batch,)

    # Tight check vs a reference with identical bf16 quantization of the MXU inputs.
    gamma_ref_q = jax.block_until_ready(model.forward_ref(users, items, domain, quantize=True))
    assert jnp.allclose(gamma, gamma_ref_q, atol=1e-3, rtol=1e-3), (gamma, gamma_ref_q)

    # Loose sanity check vs the pure-f32 reference (bf16 A/E in the matmuls).
    gamma_ref = jax.block_until_ready(model.forward_ref(users, items, domain, quantize=False))
    assert jnp.allclose(gamma, gamma_ref, atol=2e-2, rtol=2e-2), (gamma, gamma_ref)

    print("KERNEL_OK")
</pallas_src>

<mosaic_0001>
module attributes {stable_mosaic.version = 11 : i64} {
  func.func @_fused_prop_kernel(%arg0: i32, %arg1: i32, %arg2: i32, %arg3: i32, %arg4: memref<1x128x128xbf16, #tpu.memory_space<vmem>>, %arg5: memref<128x128xf32, #tpu.memory_space<vmem>>, %arg6: memref<1x128x128xf32, #tpu.memory_space<vmem>>, %arg7: memref<128x128xf32, #tpu.memory_space<vmem>>, %arg8: memref<128x128xf32, #tpu.memory_space<vmem>>) attributes {dimension_semantics = [#tpu.dimension_semantics<parallel>, #tpu.dimension_semantics<arbitrary>, #tpu.dimension_semantics<arbitrary>, #tpu.dimension_semantics<arbitrary>], iteration_bounds = array<i64: 1, 2, 1, 1>, scalar_prefetch = 0 : i64, scratch_operands = 2 : i64, tpu.core_type = #tpu.core_type<tc>, window_params = [{transform_indices = @transform_0, window_bounds = array<i64: 1, 128, 128>}, {pipeline_mode = #tpu.pipeline_mode<synchronous>, transform_indices = @transform_1, window_bounds = array<i64: 128, 128>}, {transform_indices = @transform_2, window_bounds = array<i64: 1, 128, 128>}]} {
    %c0_i32 = arith.constant 0 : i32
    %0 = arith.cmpi eq, %arg2, %c0_i32 : i32
    %c0_i32_0 = arith.constant 0 : i32
    %1 = arith.cmpi eq, %arg3, %c0_i32_0 : i32
    %2 = arith.andi %0, %1 : i1
    %3 = arith.extui %2 : i1 to i32
    %c0_i32_1 = arith.constant 0 : i32
    %4 = arith.cmpi ne, %3, %c0_i32_1 : i32
    scf.if %4 {
      %c0_i32_13 = arith.constant 0 : i32
      %22 = arith.cmpi eq, %arg1, %c0_i32_13 : i32
      %23 = arith.extui %22 : i1 to i32
      %c0_i32_14 = arith.constant 0 : i32
      %24 = arith.cmpi ne, %23, %c0_i32_14 : i32
      scf.if %24 {
        %c0_17 = arith.constant 0 : index
        %c0_18 = arith.constant 0 : index
        %28 = vector.load %arg5[%c0_17, %c0_18] : memref<128x128xf32, #tpu.memory_space<vmem>>, vector<128x128xf32>
        %c0_19 = arith.constant 0 : index
        %c0_20 = arith.constant 0 : index
        %29 = vector.load %arg7[%c0_19, %c0_20] : memref<128x128xf32, #tpu.memory_space<vmem>>, vector<128x128xf32>
        tpu.vector_store %arg7[%c0_19, %c0_20], %28 {strides = array<i32>} : memref<128x128xf32, #tpu.memory_space<vmem>>, vector<128x128xf32>,
      } else {
      }
      %c0_i32_15 = arith.constant 0 : i32
      %25 = arith.cmpi sgt, %arg1, %c0_i32_15 : i32
      %26 = arith.extui %25 : i1 to i32
      %c0_i32_16 = arith.constant 0 : i32
      %27 = arith.cmpi ne, %26, %c0_i32_16 : i32
      scf.if %27 {
        %c0_17 = arith.constant 0 : index
        %c0_18 = arith.constant 0 : index
        %c0_19 = arith.constant 0 : index
        %28 = vector.load %arg6[%c0_17, %c0_18, %c0_19] : memref<1x128x128xf32, #tpu.memory_space<vmem>>, vector<1x128x128xf32>
        %29 = vector.shape_cast %28 : vector<1x128x128xf32> to vector<128x128xf32>
        %c0_20 = arith.constant 0 : index
        %c0_21 = arith.constant 0 : index
        %30 = vector.load %arg7[%c0_20, %c0_21] : memref<128x128xf32, #tpu.memory_space<vmem>>, vector<128x128xf32>
        tpu.vector_store %arg7[%c0_20, %c0_21], %29 {strides = array<i32>} : memref<128x128xf32, #tpu.memory_space<vmem>>, vector<128x128xf32>,
      } else {
      }
    } else {
    }
    %c0_i32_2 = arith.constant 0 : i32
    %5 = arith.cmpi eq, %arg3, %c0_i32_2 : i32
    %6 = arith.extui %5 : i1 to i32
    %c0_i32_3 = arith.constant 0 : i32
    %7 = arith.cmpi ne, %6, %c0_i32_3 : i32
    scf.if %7 {
      %cst_13 = arith.constant 0.000000e+00 : f32
      %22 = vector.broadcast %cst_13 : f32 to vector<128x128xf32>
      %c0_14 = arith.constant 0 : index
      %c0_15 = arith.constant 0 : index
      %23 = vector.load %arg8[%c0_14, %c0_15] : memref<128x128xf32, #tpu.memory_space<vmem>>, vector<128x128xf32>
      tpu.vector_store %arg8[%c0_14, %c0_15], %22 {strides = array<i32>} : memref<128x128xf32, #tpu.memory_space<vmem>>, vector<128x128xf32>,
    } else {
    }
    %c128_i32 = arith.constant 128 : i32
    %8 = arith.muli %arg3, %c128_i32 : i32
    %9 = tpu.assume_multiple %8, 128 : i32
    %10 = arith.index_cast %9 : i32 to index
    %c0 = arith.constant 0 : index
    %11 = vector.load %arg7[%10, %c0] : memref<128x128xf32, #tpu.memory_space<vmem>>, vector<128x128xf32>
    %12 = arith.truncf %11 : vector<128x128xf32> to vector<128x128xbf16>
    %c0_4 = arith.constant 0 : index
    %c0_5 = arith.constant 0 : index
    %13 = vector.load %arg8[%c0_4, %c0_5] : memref<128x128xf32, #tpu.memory_space<vmem>>, vector<128x128xf32>
    %c0_6 = arith.constant 0 : index
    %c0_7 = arith.constant 0 : index
    %c0_8 = arith.constant 0 : index
    %14 = vector.load %arg4[%c0_6, %c0_7, %c0_8] : memref<1x128x128xbf16, #tpu.memory_space<vmem>>, vector<1x128x128xbf16>
    %15 = vector.shape_cast %14 : vector<1x128x128xbf16> to vector<128x128xbf16>
    %cst = arith.constant dense<0.000000e+00> : vector<128x128xf32>
    %16 = tpu.matmul %15, %12, %cst {dimension_numbers = #tpu.dot_dimension_numbers<[1], [0], [0], [1], [0, 0, 1, 1], [], []>} : vector<128x128xbf16>, vector<128x128xbf16>, vector<128x128xf32> -> vector<128x128xf32>
    %17 = arith.addf %13, %16 : vector<128x128xf32>
    %c0_9 = arith.constant 0 : index
    %c0_10 = arith.constant 0 : index
    %18 = vector.load %arg8[%c0_9, %c0_10] : memref<128x128xf32, #tpu.memory_space<vmem>>, vector<128x128xf32>
    tpu.vector_store %arg8[%c0_9, %c0_10], %17 {strides = array<i32>} : memref<128x128xf32, #tpu.memory_space<vmem>>, vector<128x128xf32>,
    %c0_i32_11 = arith.constant 0 : i32
    %19 = arith.cmpi eq, %arg3, %c0_i32_11 : i32
    %20 = arith.extui %19 : i1 to i32
    %c0_i32_12 = arith.constant 0 : i32
    %21 = arith.cmpi ne, %20, %c0_i32_12 : i32
    scf.if %21 {
      %c128_i32_13 = arith.constant 128 : i32
      %22 = arith.muli %arg2, %c128_i32_13 : i32
      %23 = tpu.assume_multiple %22, 128 : i32
      %c0_14 = arith.constant 0 : index
      %c0_15 = arith.constant 0 : index
      %24 = vector.load %arg8[%c0_14, %c0_15] : memref<128x128xf32, #tpu.memory_space<vmem>>, vector<128x128xf32>
      %cst_16 = arith.constant 0.899999976 : f32
      %25 = vector.broadcast %cst_16 : f32 to vector<128x128xf32>
      %26 = arith.mulf %25, %24 : vector<128x128xf32>
      %27 = arith.index_cast %23 : i32 to index
      %c0_17 = arith.constant 0 : index
      %28 = vector.load %arg5[%27, %c0_17] : memref<128x128xf32, #tpu.memory_space<vmem>>, vector<128x128xf32>
      %cst_18 = arith.constant 1.000000e-01 : f32
      %29 = vector.broadcast %cst_18 : f32 to vector<128x128xf32>
      %30 = arith.mulf %29, %28 : vector<128x128xf32>
      %31 = arith.addf %26, %30 : vector<128x128xf32>
      %c0_19 = arith.constant 0 : index
      %32 = arith.index_cast %23 : i32 to index
      %c0_20 = arith.constant 0 : index
      %33 = vector.load %arg6[%c0_19, %32, %c0_20] : memref<1x128x128xf32, #tpu.memory_space<vmem>>, vector<1x128x128xf32>
      %34 = vector.shape_cast %33 : vector<1x128x128xf32> to vector<128x128xf32>
      %35 = vector.shape_cast %31 : vector<128x128xf32> to vector<1x128x128xf32>
      tpu.vector_store %arg6[%c0_19, %32, %c0_20], %35 {strides = array<i32>} : memref<1x128x128xf32, #tpu.memory_space<vmem>>, vector<1x128x128xf32>,
    } else {
    }
    return
  }
  func.func @transform_0(%arg0: i32, %arg1: i32, %arg2: i32, %arg3: i32) -> (i32, i32, i32) {
    %c0_i32 = arith.constant 0 : i32
    return %arg0, %arg2, %arg3 : i32, i32, i32
  }
  func.func @transform_1(%arg0: i32, %arg1: i32, %arg2: i32, %arg3: i32) -> (i32, i32) {
    %c0_i32 = arith.constant 0 : i32
    %c0_i32_0 = arith.constant 0 : i32
    %c0_i32_1 = arith.constant 0 : i32
    return %c0_i32, %c0_i32_0 : i32, i32
  }
  func.func @transform_2(%arg0: i32, %arg1: i32, %arg2: i32, %arg3: i32) -> (i32, i32, i32) {
    %c0_i32 = arith.constant 0 : i32
    %c0_i32_0 = arith.constant 0 : i32
    %c0_i32_1 = arith.constant 0 : i32
    return %arg0, %c0_i32, %c0_i32_0 : i32, i32, i32
  }
}

</mosaic_0001>

<bundles_post_ra>
// kernel: tpu_custom_call.1
= control target key start
LH: loop header
LB: loop body
LE: loop exit
PB: predicated region body
PF: predicated region fallthrough
CT: control target
= control target key end

     0   :  { %7 = vsyncpa [#allocation5], 0  ;;  %s1094_s0 = inlined_call_operand.hbm [shape: bf16[1,128,128], index: 0, kind: input, shape index: {}]   ;;  %s1095_s1 = inlined_call_operand.hbm [shape: f32[128,128], index: 1, kind: input, shape index: {}]   ;;  %s1096_s2 = inlined_call_operand.hbm [shape: f32[1,128,128], index: 2, kind: output, shape index: {}]  }
   0x1   :  { %8 = vsyncpa [#allocation8], 0 }
   0x2   :  { %9 = vsyncpa [#allocation6], 0  ;;  %s999_s9 = smov 0   ;;  %s1001_s10 = smov 0  }
   0x3   :  { %s1003_s11 = smov 0  }
   0x4 LB: > { %s712_s12 = sadd.s32 4294967295, %s973_s11   ;;  %s37_s13 = sadd.s32 1, %s969_s10  ;;  %s973_s11 = sphi %s1003_s11, %s15_s11   ;;  %s969_s10 = sphi %s1001_s10, %s1102_s10   ;;  %s965_s9 = sphi %s999_s9, %s1101_s9  }
   0x5   : > { %p39_p0 = scmp.ge.s32.totalorder %s37_s13, 2  ;;  %p713_p1 = scmp.ge.s32.totalorder %s973_s11, 1 }
   0x6   : > { %p123_p2 = scmp.lt.s32.totalorder %s973_s11, 3  ;;  %p1026_p4 = scmp.eq.s32.totalorder %s712_s12, 0 }
   0x7   : > { %s1104_s13 = smov (%p39_p0, %s37_s13), 0  ;;  %s975_s16 = smov [#allocation4]  }
   0x8   : > { %p1020_p3 = pnand %p713_p1, %p123_p2  ;;  %s141_s17 = sshll.u32 %s975_s16, 4  ;;  %s142_s17 = int_to_ptr.vmem [resolvable:$true] %s141_s17 }
   0x9   : > { %s976_s19 = smov [#allocation7]   ;;  %s874_s21 = scalar_lea.vmem %s142_s17, 1024 }
   0xa   : > { %p809_p5 = pneg %p1020_p3  ;;  %s154_s20 = sshll.u32 %s976_s19, 4  ;;  %s155_s20 = int_to_ptr.vmem [resolvable:$true] %s154_s20 }
   0xb   : > { %p875_p8 = scmp.ne.s32.totalorder %s142_s17, %s874_s21  ;;  %p882_p11 = scmp.lt.s32.totalorder %s142_s17, %s142_s17 }
   0xc   : > { %p1034_p6 = pnand %p1026_p4, %p809_p5  ;;  %p883_p12 = scmp.lt.s32.totalorder %s874_s21, %s874_s21 }
   0xe   : > { %p865_p7 = pneg %p1034_p6  ;;  %p884_p13 = por %p883_p12, %p882_p11 }
  0x10   : > { %p877_p9 = pnand %p875_p8, %p865_p7 }
  0x12   : > { %p878_p10 = pneg %p877_p9 }
  0x14   : > { %p885_p0 = pnand %p884_p13, %p878_p10 }
  0x16   : > { %888 = shalt.err (!%p885_p0)
}
  0x17   : > { %s977_s22 = smov 64   ;;  %s978_s23 = smov 4  }
  0x18   : > { %812 = dma.hbm_to_vmem [thread:$0]  (!%p1034_p6), %s1094_s0, 1024, %s142_s17, [#allocation5], %s977_s22, %s977_s22, %s978_s23  }
  0x19   : > { %s900_s26 = scalar_lea.vmem %s155_s20, 2048  ;;  %p908_p8 = scmp.lt.s32.totalorder %s155_s20, %s155_s20 }
  0x1a   : > { %p901_p1 = scmp.ne.s32.totalorder %s155_s20, %s900_s26  ;;  %p909_p9 = scmp.lt.s32.totalorder %s900_s26, %s900_s26 }
  0x1c   : > { %p903_p2 = pnand %p901_p1, %p865_p7  ;;  %p910_p11 = por %p909_p9, %p908_p8 }
  0x1e   : > { %p904_p5 = pneg %p903_p2 }
  0x20   : > { %p911_p10 = pnand %p910_p11, %p904_p5 }
  0x22   : > { %914 = shalt.err (!%p911_p10)
}
  0x23   : > { %s979_s27 = smov 128   ;;  %s980_s28 = smov 8  }
  0x24   : > { %815 = dma.hbm_to_vmem [thread:$0]  (!%p1034_p6), %s1095_s1, 2048, %s155_s20, [#allocation8], %s979_s27, %s979_s27, %s980_s28  }
  0x25   : > { %170 = sbr.rel (%p1020_p3) target bundleno = 335 (0x14f), region = 28 }
  0x2a   : > { %952 = dma.done.wait (%p1026_p4), [#allocation5], 1024  }
  0x2b   : > { %954 = vsyncadd (%p1026_p4), [#allocation5], 4294966272 }
  0x2c   : > { %956 = dma.done.wait (%p1026_p4), [#allocation8], 2048  }
  0x2d   : > { %958 = vsyncadd (%p1026_p4), [#allocation8], 4294965248  ;;  %p719_p7 = scmp.ne.s32.totalorder %s965_s9, 0 }
  0x2f   : > { %197 = sbr.rel (%p719_p7) target bundleno = 61 (0x3d), region = 44 }
  0x34   : > { %v198_v0 = vld [vmem:[#allocation7] sm:$0xff]  ;;  %v199_v1 = vld [vmem:[#allocation7 + $0x8] sm:$0xff]  ;;  %v200_v2 = vld [vmem:[#allocation7 + $0x10] sm:$0xff] }
  0x35   : > { %214 = vst [vmem:[#allocation2 + $0x30] sm:$0xff] %v198_v0  ;;  %215 = vst [vmem:[#allocation2] sm:$0xff] %v199_v1  ;;  %v201_v3 = vld [vmem:[#allocation7 + $0x18] sm:$0xff]  ;;  %v202_v4 = vld [vmem:[#allocation7 + $0x20] sm:$0xff] }
  0x36   : > { %216 = vst [vmem:[#allocation2 + $0x58] sm:$0xff] %v200_v2  ;;  %v203_v5 = vld [vmem:[#allocation7 + $0x28] sm:$0xff]  ;;  %217 = vst [vmem:[#allocation2 + $0x18] sm:$0xff] %v201_v3  ;;  %v204_v6 = vld [vmem:[#allocation7 + $0x30] sm:$0xff] }
  0x37   : > { %218 = vst [vmem:[#allocation2 + $0x50] sm:$0xff] %v202_v4  ;;  %219 = vst [vmem:[#allocation2 + $0x68] sm:$0xff] %v203_v5  ;;  %v205_v7 = vld [vmem:[#allocation7 + $0x38] sm:$0xff]  ;;  %v206_v8 = vld [vmem:[#allocation7 + $0x40] sm:$0xff] }
  0x38   : > { %220 = vst [vmem:[#allocation2 + $0x8] sm:$0xff] %v204_v6  ;;  %221 = vst [vmem:[#allocation2 + $0x48] sm:$0xff] %v205_v7  ;;  %v207_v9 = vld [vmem:[#allocation7 + $0x48] sm:$0xff]  ;;  %v208_v10 = vld [vmem:[#allocation7 + $0x50] sm:$0xff] }
  0x39   : > { %222 = vst [vmem:[#allocation2 + $0x40] sm:$0xff] %v206_v8  ;;  %v209_v11 = vld [vmem:[#allocation7 + $0x58] sm:$0xff]  ;;  %223 = vst [vmem:[#allocation2 + $0x20] sm:$0xff] %v207_v9  ;;  %v210_v12 = vld [vmem:[#allocation7 + $0x60] sm:$0xff] }
  0x3a   : > { %224 = vst [vmem:[#allocation2 + $0x10] sm:$0xff] %v208_v10  ;;  %225 = vst [vmem:[#allocation2 + $0x38] sm:$0xff] %v209_v11  ;;  %v211_v13 = vld [vmem:[#allocation7 + $0x68] sm:$0xff]  ;;  %v212_v14 = vld [vmem:[#allocation7 + $0x70] sm:$0xff] }
  0x3b   : > { %226 = vst [vmem:[#allocation2 + $0x60] sm:$0xff] %v210_v12  ;;  %227 = vst [vmem:[#allocation2 + $0x70] sm:$0xff] %v211_v13  ;;  %v213_v15 = vld [vmem:[#allocation7 + $0x78] sm:$0xff] }
  0x3c   : > { %228 = vst [vmem:[#allocation2 + $0x78] sm:$0xff] %v212_v14  ;;  %229 = vst [vmem:[#allocation2 + $0x28] sm:$0xff] %v213_v15 }
  0x3d PF: > { %p720_p3 = scmp.le.s32.totalorder %s965_s9, 0 }
  0x3f   : > { %233 = sbr.rel (%p720_p3) target bundleno = 77 (0x4d), region = 48 }
  0x44   : > { %v234_v16 = vld [vmem:[#allocation9] sm:$0xff]  ;;  %v235_v17 = vld [vmem:[#allocation9 + $0x8] sm:$0xff]  ;;  %v236_v18 = vld [vmem:[#allocation9 + $0x10] sm:$0xff] }
  0x45   : > { %250 = vst [vmem:[#allocation2 + $0x30] sm:$0xff] %v234_v16  ;;  %251 = vst [vmem:[#allocation2] sm:$0xff] %v235_v17  ;;  %v237_v19 = vld [vmem:[#allocation9 + $0x18] sm:$0xff]  ;;  %v238_v20 = vld [vmem:[#allocation9 + $0x20] sm:$0xff] }
  0x46   : > { %252 = vst [vmem:[#allocation2 + $0x58] sm:$0xff] %v236_v18  ;;  %v239_v21 = vld [vmem:[#allocation9 + $0x28] sm:$0xff]  ;;  %253 = vst [vmem:[#allocation2 + $0x18] sm:$0xff] %v237_v19  ;;  %v240_v22 = vld [vmem:[#allocation9 + $0x30] sm:$0xff] }
  0x47   : > { %254 = vst [vmem:[#allocation2 + $0x50] sm:$0xff] %v238_v20  ;;  %255 = vst [vmem:[#allocation2 + $0x68] sm:$0xff] %v239_v21  ;;  %v241_v23 = vld [vmem:[#allocation9 + $0x38] sm:$0xff]  ;;  %v242_v24 = vld [vmem:[#allocation9 + $0x40] sm:$0xff] }
  0x48   : > { %256 = vst [vmem:[#allocation2 + $0x8] sm:$0xff] %v240_v22  ;;  %257 = vst [vmem:[#allocation2 + $0x48] sm:$0xff] %v241_v23  ;;  %v243_v25 = vld [vmem:[#allocation9 + $0x48] sm:$0xff]  ;;  %v244_v26 = vld [vmem:[#allocation9 + $0x50] sm:$0xff] }
  0x49   : > { %258 = vst [vmem:[#allocation2 + $0x40] sm:$0xff] %v242_v24  ;;  %v245_v27 = vld [vmem:[#allocation9 + $0x58] sm:$0xff]  ;;  %259 = vst [vmem:[#allocation2 + $0x20] sm:$0xff] %v243_v25  ;;  %v246_v28 = vld [vmem:[#allocation9 + $0x60] sm:$0xff] }
  0x4a   : > { %260 = vst [vmem:[#allocation2 + $0x10] sm:$0xff] %v244_v26  ;;  %261 = vst [vmem:[#allocation2 + $0x38] sm:$0xff] %v245_v27  ;;  %v247_v29 = vld [vmem:[#allocation9 + $0x68] sm:$0xff]  ;;  %v248_v30 = vld [vmem:[#allocation9 + $0x70] sm:$0xff] }
  0x4b   : > { %262 = vst [vmem:[#allocation2 + $0x60] sm:$0xff] %v246_v28  ;;  %263 = vst [vmem:[#allocation2 + $0x70] sm:$0xff] %v247_v29  ;;  %v249_v31 = vld [vmem:[#allocation9 + $0x78] sm:$0xff] }
  0x4c   : > { %264 = vst [vmem:[#allocation2 + $0x78] sm:$0xff] %v248_v30  ;;  %265 = vst [vmem:[#allocation2 + $0x28] sm:$0xff] %v249_v31 }
  0x4d PF: > { %v855_v43 = vld [vmem:[#allocation4] sm:$0xff]   ;;  %v289_v52 = vld [vmem:[#allocation2 + $0x58] sm:$0xff]  ;;  %v287_v55 = vld [vmem:[#allocation2 + $0x30] sm:$0xff]  ;;  %s981_s3 = smov [#allocation9]   ;;  %p1070_p4 = scmp.eq.s32.totalorder %s712_s12, 1 }
  0x4e   : > { %v856_v44 = vld [vmem:[#allocation4 + $0x20] sm:$0xff]   ;;  %765 = vmatprep.mubr.bf16.mxu0 %v855_v43  ;;  %v291_v49 = vld [vmem:[#allocation2 + $0x50] sm:$0xff]  ;;  %v292_v50 = vld [vmem:[#allocation2 + $0x68] sm:$0xff]  ;;  %s631_s4 = sshll.u32 %s981_s3, 4  ;;  %s632_s4 = int_to_ptr.vmem [resolvable:$true] %s631_s4 }
  0x4f   : > { %v293_v46 = vld [vmem:[#allocation2 + $0x8] sm:$0xff]  ;;  %773 = vmatprep.mubr.bf16.mxu1 %v856_v44  ;;  %v305_v51 = vpack.c.bf16 %v292_v50, %v291_v49  ;;  %v290_v53 = vld [vmem:[#allocation2 + $0x18] sm:$0xff]  ;;  %v288_v56 = vld [vmem:[#allocation2] sm:$0xff]  ;;  %s915_s6 = scalar_lea.vmem %s632_s4, 2048  ;;  %p922_p0 = scmp.lt.s32.totalorder %s632_s4, %s632_s4 }
  0x50   : > { %v295_v40 = vld [vmem:[#allocation2 + $0x40] sm:$0xff]  ;;  %v294_v47 = vld [vmem:[#allocation2 + $0x48] sm:$0xff]  ;;  %v304_v54 = vpack.c.bf16 %v290_v53, %v289_v52  ;;  %v303_v57 = vpack.c.bf16 %v288_v56, %v287_v55  ;;  %v859_v60 = vld [vmem:[#allocation4 + $0x10] sm:$0xff]   ;;  %p916_p6 = scmp.ne.s32.totalorder %s632_s4, %s915_s6  ;;  %p923_p1 = scmp.lt.s32.totalorder %s915_s6, %s915_s6 }
  0x51   : > { %v297_v38 = vld [vmem:[#allocation2 + $0x10] sm:$0xff]  ;;  %v298_v39 = vld [vmem:[#allocation2 + $0x38] sm:$0xff]  ;;  %v296_v42 = vld [vmem:[#allocation2 + $0x20] sm:$0xff]  ;;  %v306_v48 = vpack.c.bf16 %v294_v47, %v293_v46 }
  0x52   : > { %v299_v34 = vld [vmem:[#allocation2 + $0x60] sm:$0xff]  ;;  %v300_v36 = vld [vmem:[#allocation2 + $0x70] sm:$0xff]  ;;  %v308_v41 = vpack.c.bf16 %v298_v39, %v297_v38  ;;  %v307_v45 = vpack.c.bf16 %v296_v42, %v295_v40  ;;  %v857_v58 = vld [vmem:[#allocation4 + $0x8] sm:$0xff]   ;;  %p917_p12 = pnand %p916_p6, %p1070_p4  ;;  %p924_p2 = por %p923_p1, %p922_p0 }
  0x53   : > { %v301_v32 = vld [vmem:[#allocation2 + $0x78] sm:$0xff]  ;;  %v302_v33 = vld [vmem:[#allocation2 + $0x28] sm:$0xff]  ;;  %v309_v37 = vpack.c.bf16 %v300_v36, %v299_v34  ;;  %v860_v61 = vld [vmem:[#allocation4 + $0x30] sm:$0xff]  }
  0x54   : > { %v310_v35 = vpack.c.bf16 %v302_v33, %v301_v32  ;;  %v858_v59 = vld [vmem:[#allocation4 + $0x28] sm:$0xff]   ;;  %v861_v62 = vld [vmem:[#allocation4 + $0x18] sm:$0xff]   ;;  %v559_v0 = vld [vmem:[#allocation7 + $0x10] sm:$0xff]  ;;  %p918_p13 = pneg %p917_p12 }
  0x55   : > { %v862_v63 = vld [vmem:[#allocation4 + $0x38] sm:$0xff]   ;;  %v567_v1 = vld [vmem:[#allocation7 + $0x50] sm:$0xff]  ;;  %v557_v2 = vld [vmem:[#allocation7] sm:$0xff]  ;;  %v575_v4 = vmul.f32 0.1, %v559_v0 }
  0x56   : > { %749 = vmatprep.subr.bf16.mxu0 %v310_v35  ;;  %781 = vmatprep.subr.bf16.mxu1 %v310_v35  ;;  %v565_v3 = vld [vmem:[#allocation7 + $0x40] sm:$0xff]  ;;  %v583_v5 = vmul.f32 0.1, %v567_v1  ;;  %v560_v6 = vld [vmem:[#allocation7 + $0x18] sm:$0xff]  ;;  %v573_v10 = vmul.f32 0.1, %v557_v2  ;;  %p925_p5 = pnand %p924_p2, %p918_p13 }
  0x57   : > { %750 = vmatpush3.bf16.msra.mxu0 %v310_v35  ;;  %789 = vmatpush3.bf16.msra.mxu1 %v310_v35  ;;  %v568_v7 = vld [vmem:[#allocation7 + $0x58] sm:$0xff]  ;;  %v581_v11 = vmul.f32 0.1, %v565_v3  ;;  %v558_v14 = vld [vmem:[#allocation7 + $0x8] sm:$0xff]  ;;  %v576_v18 = vmul.f32 0.1, %v560_v6 }
  0x58   : > { %751 = vmatprep.subr.bf16.mxu0 %v309_v37  ;;  %782 = vmatprep.subr.bf16.mxu1 %v309_v37  ;;  %v566_v15 = vld [vmem:[#allocation7 + $0x48] sm:$0xff]  ;;  %v584_v19 = vmul.f32 0.1, %v568_v7  ;;  %v563_v24 = vld [vmem:[#allocation7 + $0x30] sm:$0xff]  ;;  %v574_v28 = vmul.f32 0.1, %v558_v14 }
  0x59   : > { %v571_v25 = vld [vmem:[#allocation7 + $0x70] sm:$0xff]  ;;  %v582_v29 = vmul.f32 0.1, %v566_v15  ;;  %v561_v34 = vld [vmem:[#allocation7 + $0x20] sm:$0xff]  ;;  %v579_v38 = vmul.f32 0.1, %v563_v24 }
  0x5a   : > { %v569_v35 = vld [vmem:[#allocation7 + $0x60] sm:$0xff]  ;;  %v587_v39 = vmul.f32 0.1, %v571_v25  ;;  %v564_v44 = vld [vmem:[#allocation7 + $0x38] sm:$0xff]  ;;  %v570_v55 = vld [vmem:[#allocation7 + $0x68] sm:$0xff] }
  0x5b   : > { %752 = vmatpush3.bf16.msra.mxu0 %v309_v37  ;;  %790 = vmatpush3.bf16.msra.mxu1 %v309_v37  ;;  %v585_v49 = vmul.f32 0.1, %v569_v35  ;;  %v586_v3 = vmul.f32 0.1, %v570_v55 }
  0x5c   : > { %753 = vmatprep.subr.bf16.mxu0 %v308_v41  ;;  %783 = vmatprep.subr.bf16.mxu1 %v308_v41 }
  0x5f   : > { %754 = vmatpush3.bf16.msra.mxu0 %v308_v41  ;;  %791 = vmatpush3.bf16.msra.mxu1 %v308_v41 }
  0x60   : > { %755 = vmatprep.subr.bf16.mxu0 %v307_v45  ;;  %784 = vmatprep.subr.bf16.mxu1 %v307_v45 }
  0x63   : > { %756 = vmatpush3.bf16.msra.mxu0 %v307_v45  ;;  %792 = vmatpush3.bf16.msra.mxu1 %v307_v45  ;;  %v572_v45 = vld [vmem:[#allocation7 + $0x78] sm:$0xff] }
  0x64   : > { %757 = vmatprep.subr.bf16.mxu0 %v306_v48  ;;  %785 = vmatprep.subr.bf16.mxu1 %v306_v48 }
  0x67   : > { %758 = vmatpush3.bf16.msra.mxu0 %v306_v48  ;;  %793 = vmatpush3.bf16.msra.mxu1 %v306_v48  ;;  %v577_v48 = vmul.f32 0.1, %v561_v34 }
  0x68   : > { %759 = vmatprep.subr.bf16.mxu0 %v305_v51  ;;  %786 = vmatprep.subr.bf16.mxu1 %v305_v51 }
  0x6b   : > { %760 = vmatpush3.bf16.msra.mxu0 %v305_v51  ;;  %794 = vmatpush3.bf16.msra.mxu1 %v305_v51 }
  0x6c   : > { %761 = vmatprep.subr.bf16.mxu0 %v304_v54  ;;  %787 = vmatprep.subr.bf16.mxu1 %v304_v54 }
  0x6f   : > { %762 = vmatpush3.bf16.msra.mxu0 %v304_v54  ;;  %795 = vmatpush3.bf16.msra.mxu1 %v304_v54  ;;  %v562_v54 = vld [vmem:[#allocation7 + $0x28] sm:$0xff] }
  0x70   : > { %763 = vmatprep.subr.bf16.mxu0 %v303_v57  ;;  %788 = vmatprep.subr.bf16.mxu1 %v303_v57  ;;  %v578_v2 = vmul.f32 0.1, %v562_v54 }
  0x73   : > { %764 = vmatpush3.bf16.msra.mxu0 %v303_v57  ;;  %796 = vmatpush3.bf16.msra.mxu1 %v303_v57 }
  0x76   : > { %766 = vmatmul.mubr.bf16.vlgmr.msra.gmra.mxu0 %v857_v58  ;;  %774 = vmatmul.mubr.bf16.vlgmr.msra.gmra.mxu1 %v858_v59  ;;  %v580_v58 = vmul.f32 0.1, %v564_v44  ;;  %v588_v59 = vmul.f32 0.1, %v572_v45 }
  0x77   : > { %769 = vmatprep.mubr.bf16.mxu0 %v859_v60  ;;  %777 = vmatprep.mubr.bf16.mxu1 %v860_v61 }
  0x7e   : > { %770 = vmatmul.mubr.bf16.gmra.mxu0 %v861_v62  ;;  %778 = vmatmul.mubr.bf16.gmra.mxu1 %v862_v63 }
 0x136   : > { %v767_v8 = vpop.f32.mrf.mxu0  ;;  %v775_v9 = vpop.f32.mrf.mxu1 }
 0x137   : > { %v542_v12 = vmul.f32 0.9, %v767_v8  ;;  %v550_v13 = vmul.f32 0.9, %v775_v9 }
 0x138   : > { %v425_v16 = vpop.f32.mrf.mxu0  ;;  %v457_v17 = vpop.f32.mrf.mxu1 }
 0x139   : > { %v591_v20 = vadd.f32 %v575_v4, %v542_v12  ;;  %v599_v21 = vadd.f32 %v583_v5, %v550_v13  ;;  %v540_v22 = vmul.f32 0.9, %v425_v16  ;;  %v548_v23 = vmul.f32 0.9, %v457_v17 }
 0x13a   : > { %v768_v26 = vpop.f32.mrf.mxu0  ;;  %v776_v27 = vpop.f32.mrf.mxu1 }
 0x13b   : > { %608 = vst [vmem:[#allocation9 + $0x10] sm:$0xff] %v591_v20  ;;  %616 = vst [vmem:[#allocation9 + $0x50] sm:$0xff] %v599_v21  ;;  %v589_v30 = vadd.f32 %v573_v10, %v540_v22  ;;  %v597_v31 = vadd.f32 %v581_v11, %v548_v23  ;;  %v543_v32 = vmul.f32 0.9, %v768_v26  ;;  %v551_v33 = vmul.f32 0.9, %v776_v27 }
 0x13c   : > { %v428_v36 = vpop.f32.mrf.mxu0  ;;  %v460_v37 = vpop.f32.mrf.mxu1 }
 0x13d   : > { %606 = vst [vmem:[#allocation9] sm:$0xff] %v589_v30  ;;  %614 = vst [vmem:[#allocation9 + $0x40] sm:$0xff] %v597_v31  ;;  %v592_v40 = vadd.f32 %v576_v18, %v543_v32  ;;  %v600_v41 = vadd.f32 %v584_v19, %v551_v33  ;;  %v541_v42 = vmul.f32 0.9, %v428_v36  ;;  %v549_v43 = vmul.f32 0.9, %v460_v37 }
 0x13e   : > { %v771_v46 = vpop.f32.mrf.mxu0  ;;  %v779_v47 = vpop.f32.mrf.mxu1 }
 0x13f   : > { %609 = vst [vmem:[#allocation9 + $0x18] sm:$0xff] %v592_v40  ;;  %617 = vst [vmem:[#allocation9 + $0x58] sm:$0xff] %v600_v41  ;;  %v590_v50 = vadd.f32 %v574_v28, %v541_v42  ;;  %v598_v51 = vadd.f32 %v582_v29, %v549_v43  ;;  %v546_v52 = vmul.f32 0.9, %v771_v46  ;;  %v554_v53 = vmul.f32 0.9, %v779_v47 }
 0x140   : > { %v441_v56 = vpop.f32.mrf.mxu0  ;;  %v473_v57 = vpop.f32.mrf.mxu1 }
 0x141   : > { %607 = vst [vmem:[#allocation9 + $0x8] sm:$0xff] %v590_v50  ;;  %615 = vst [vmem:[#allocation9 + $0x48] sm:$0xff] %v598_v51  ;;  %v595_v60 = vadd.f32 %v579_v38, %v546_v52  ;;  %v603_v61 = vadd.f32 %v587_v39, %v554_v53  ;;  %v544_v62 = vmul.f32 0.9, %v441_v56  ;;  %v552_v63 = vmul.f32 0.9, %v473_v57 }
 0x142   : > { %v772_v0 = vpop.f32.mrf.mxu0  ;;  %v780_v1 = vpop.f32.mrf.mxu1 }
 0x143   : > { %612 = vst [vmem:[#allocation9 + $0x30] sm:$0xff] %v595_v60  ;;  %620 = vst [vmem:[#allocation9 + $0x70] sm:$0xff] %v603_v61  ;;  %v593_v4 = vadd.f32 %v577_v48, %v544_v62  ;;  %v601_v5 = vadd.f32 %v585_v49, %v552_v63  ;;  %v547_v6 = vmul.f32 0.9, %v772_v0  ;;  %v555_v7 = vmul.f32 0.9, %v780_v1 }
 0x144   : > { %v444_v8 = vpop.f32.mrf.mxu0  ;;  %v476_v9 = vpop.f32.mrf.mxu1 }
 0x145   : > { %610 = vst [vmem:[#allocation9 + $0x20] sm:$0xff] %v593_v4  ;;  %618 = vst [vmem:[#allocation9 + $0x60] sm:$0xff] %v601_v5  ;;  %v596_v10 = vadd.f32 %v580_v58, %v547_v6  ;;  %v604_v11 = vadd.f32 %v588_v59, %v555_v7  ;;  %v545_v12 = vmul.f32 0.9, %v444_v8  ;;  %v553_v13 = vmul.f32 0.9, %v476_v9 }
 0x147   : > { %613 = vst [vmem:[#allocation9 + $0x38] sm:$0xff] %v596_v10  ;;  %621 = vst [vmem:[#allocation9 + $0x78] sm:$0xff] %v604_v11  ;;  %v594_v14 = vadd.f32 %v578_v2, %v545_v12  ;;  %v602_v15 = vadd.f32 %v586_v3, %v553_v13 }
 0x149   : > { %611 = vst [vmem:[#allocation9 + $0x28] sm:$0xff] %v594_v14  ;;  %619 = vst [vmem:[#allocation9 + $0x68] sm:$0xff] %v602_v15 }
 0x14a   : > { %928 = shalt.err (!%p925_p5)
}
 0x14b   : > { %s982_s7 = smov 128   ;;  %s983_s8 = smov 8  }
 0x14c   : > { %806 = dma.vmem_to_hbm [thread:$0]  (%p1070_p4), %s632_s4, 2048, %s1096_s2, [#allocation6], %s982_s7, %s982_s7, %s983_s8  }
 0x14d   : > { %960 = dma.done.wait (%p1070_p4), [#allocation6], 2048  }
 0x14e   : > { %962 = vsyncadd (%p1070_p4), [#allocation6], 4294965248 }
 0x14f PF: > { %s15_s11 = sadd.s32 1, %s973_s11   ;;  %s1101_s9 = smov %s969_s10 }
 0x150   : > { %p12_p8 = scmp.ge.s32.totalorder %s15_s11, 4   ;;  %s1102_s10 = smov %s1104_s13 }
 0x152   :  { %14 = sbr.rel (!%p12_p8) target bundleno = 4 (0x4), region = 86 }
 0x157   :  { %647 = vsyncpa [#allocation5], 1 }
 0x158   :  { %649 = vsyncpa [#allocation5 + $0x1], 1 }
 0x159   :  { %650 = vsyncpa [#allocation8], 1 }
 0x15a   :  { %651 = vsyncpa [#allocation6], 1 }
 0x15b   :  { %653 = vsyncpa [#allocation6 + $0x1], 1 }

</bundles_post_ra>
